<compile_context>
chip_gen: v6e
topology: v6e:2x2x1
jax: 0.10.0
libtpu: 0.0.40
codegen_flags: <defaults>
</compile_context>

<pallas_src>
import jax
import jax.numpy as jnp
from jax import lax
from jax.experimental import pallas as pl
from jax.experimental.pallas import tpu as pltpu


_BT = 8  # batch tile: fills all 8 sublanes of a vreg


def _round_up(n, m):
    return ((n + m - 1) // m) * m


def _lstm_gather_kernel(places_ref, x_ref, wih_ref, whh_ref, b_ref, out_ref,
                        gin_scr):
    """One batch tile of the LSTM recurrence + final-state gather.

    places_ref: [Bt, 1]       int32  gather timestep per row
    x_ref:      [1, S*Bt, D]  bf16   time-major flattened input (row = s*Bt + b)
    wih_ref:    [D, Gp]       bf16   input->hidden weights, gate order (i,f,o,g)
    whh_ref:    [H, Gp]       f32    hidden->hidden weights, gate order (i,f,o,g)
    b_ref:      [1, Gp]       f32    combined bias (b_ih + b_hh)
    out_ref:    [Bt, H]       f32    gathered hidden state
    gin_scr:    [S*Bt, Gp]    f32    precomputed input projection
    """
    _, SB, _ = x_ref.shape
    H, Gp = whh_ref.shape
    Bt = out_ref.shape[0]
    S = SB // Bt

    # ---- fused input projection: ONE MXU weight push for all S timesteps ----
    gin_scr[...] = (
        jnp.dot(x_ref[0], wih_ref[...], preferred_element_type=jnp.float32)
        + b_ref[...])

    whh = whh_ref[...]                                     # f32, stays resident
    places = places_ref[...]                               # [Bt, 1] int32

    # Gates packed (i, f, o, g): sigmoid on the first 3H lanes, tanh on the rest.
    lane = lax.broadcasted_iota(jnp.int32, (Bt, Gp), 1)
    sig_mask = lane < 3 * H

    zeros = jnp.zeros((Bt, H), jnp.float32)

    def step(t, carry):
        h, c, out = carry
        row = pl.multiple_of(t * Bt, Bt)                   # sublane-aligned read
        gates = (jnp.dot(h, whh, preferred_element_type=jnp.float32)
                 + gin_scr[pl.ds(row, Bt), :])             # [Bt, Gp] f32
        # One sigmoid + one tanh EUP push per step, lane-selected.
        act = jnp.where(sig_mask, jax.nn.sigmoid(gates), jnp.tanh(gates))
        i_g = act[:, 0 * H:1 * H]
        f_g = act[:, 1 * H:2 * H]
        o_g = act[:, 2 * H:3 * H]
        g_g = act[:, 3 * H:4 * H]
        c_new = f_g * c + i_g * g_g
        h_new = o_g * jnp.tanh(c_new)
        out = jnp.where(places == t, h_new, out)           # rows ending at t
        return h_new, c_new, out

    # TODO(synk): cap unroll / move S onto the grid for production S, H.
    _, _, out = lax.fori_loop(0, S, step, (zeros, zeros, zeros), unroll=True)
    out_ref[...] = out                                     # single store per tile


def pack_lstm_params(w_ih, w_hh, b_ih, b_hh):
    """Pre-pack PyTorch-layout LSTM params (call once, outside the forward).

    Gate rows reordered from PyTorch (i, f, g, o) to (i, f, o, g); gate axis
    padded to a multiple of 128 lanes (no-op when 4H == 128).
    """
    H = w_hh.shape[1]
    Gp = _round_up(4 * H, 128)

    def reorder(w):                     # rows i,f,g,o -> i,f,o,g along axis 0
        i, f, g, o = jnp.split(w, 4, axis=0)
        return jnp.concatenate([i, f, o, g], axis=0)

    def pad_cols(w):                    # [rows, 4H] -> [rows, Gp]
        return jnp.pad(w, ((0, 0), (0, Gp - 4 * H)))

    wih = pad_cols(reorder(w_ih).T.astype(jnp.float32)).astype(jnp.bfloat16)
    whh = pad_cols(reorder(w_hh).T.astype(jnp.float32))                 # f32
    bias = pad_cols(reorder((b_ih + b_hh).astype(jnp.float32)).reshape(1, 4 * H))
    return wih, whh, bias


@jax.jit
def compressor1_forward(x, real_positions, wih_packed, whh_packed, bias_packed):
    """x: [B, S, D] float32, real_positions: [B, S]; returns [B, H] float32."""
    B, S, D = x.shape
    H, Gp = whh_packed.shape
    Bt = _BT
    Bp = _round_up(B, Bt)
    n_tiles = Bp // Bt

    # Pad batch to full sublanes; lay out each tile time-major and flattened
    # so the kernel sees a contiguous [S*Bt, D] slab (row = s*Bt + b).
    x_p = jnp.zeros((Bp, S, D), jnp.bfloat16).at[:B].set(x.astype(jnp.bfloat16))
    x_tiles = (x_p.reshape(n_tiles, Bt, S, D)
               .transpose(0, 2, 1, 3)
               .reshape(n_tiles, S * Bt, D))

    lengths = jnp.sum(real_positions.astype(jnp.float32), axis=-1).astype(jnp.int32)
    places = lengths - 1
    # PyTorch gather with index -1 (zero-length row) selects the last timestep.
    places = jnp.where(places < 0, places + S, places)
    places_p = jnp.zeros((Bp, 1), jnp.int32).at[:B, 0].set(places)

    out = pl.pallas_call(
        _lstm_gather_kernel,
        out_shape=jax.ShapeDtypeStruct((Bp, H), jnp.float32),
        grid_spec=pltpu.PrefetchScalarGridSpec(
            num_scalar_prefetch=0,
            grid=(n_tiles,),
            in_specs=[
                pl.BlockSpec((Bt, 1), lambda g: (g, 0)),            # places
                pl.BlockSpec((1, S * Bt, D), lambda g: (g, 0, 0)),  # x tile
                pl.BlockSpec((D, Gp), lambda g: (0, 0)),            # W_ih
                pl.BlockSpec((H, Gp), lambda g: (0, 0)),            # W_hh
                pl.BlockSpec((1, Gp), lambda g: (0, 0)),            # bias
            ],
            out_specs=pl.BlockSpec((Bt, H), lambda g: (g, 0)),
            scratch_shapes=[pltpu.VMEM((S * Bt, Gp), jnp.float32)],
        ),
        compiler_params=pltpu.CompilerParams(
            dimension_semantics=("parallel",)),
    )(places_p, x_tiles, wih_packed, whh_packed, bias_packed)

    return out[:B]


def compressor1_reference(x, real_positions, w_ih, w_hh, b_ih, b_hh):
    """Pure-JAX f32 reference matching PyTorch nn.LSTM + gather semantics."""
    B, S, D = x.shape
    H = w_hh.shape[1]

    def cell(carry, x_t):
        h, c = carry
        gates = x_t @ w_ih.T + h @ w_hh.T + b_ih + b_hh
        i, f, g, o = jnp.split(gates, 4, axis=-1)
        i, f, o = jax.nn.sigmoid(i), jax.nn.sigmoid(f), jax.nn.sigmoid(o)
        g = jnp.tanh(g)
        c = f * c + i * g
        h = o * jnp.tanh(c)
        return (h, c), h

    h0 = jnp.zeros((B, H), jnp.float32)
    c0 = jnp.zeros((B, H), jnp.float32)
    _, hs = lax.scan(cell, (h0, c0), jnp.transpose(x, (1, 0, 2)))
    r_out = jnp.transpose(hs, (1, 0, 2))                            # [B, S, H]
    lengths = real_positions.sum(-1).astype(jnp.int32)
    places = lengths - 1
    return r_out[jnp.arange(B), places]


if __name__ == "__main__":
    # Synthetic Config.vector_sizes: input dim D = 32, hidden dim H = 32.
    B, S, D, H = 4, 8, 32, 32

    key = jax.random.PRNGKey(0)
    kx, k1, k2, k3, k4 = jax.random.split(key, 5)

    # Deterministic LSTM parameters (PyTorch-style uniform(-1/sqrt(H), 1/sqrt(H))).
    bound = 1.0 / jnp.sqrt(jnp.float32(H))
    w_ih = jax.random.uniform(k1, (4 * H, D), jnp.float32, -bound, bound)
    w_hh = jax.random.uniform(k2, (4 * H, H), jnp.float32, -bound, bound)
    b_ih = jax.random.uniform(k3, (4 * H,), jnp.float32, -bound, bound)
    b_hh = jax.random.uniform(k4, (4 * H,), jnp.float32, -bound, bound)
    # TODO(synk): nn.LayerNorm(H) params exist in the module but are unused in forward().

    x = jax.random.normal(kx, (B, S, D), jnp.float32)

    # real_positions: per-row prefix masks with varying valid lengths.
    lengths = jnp.array([5, 8, 1, 3], dtype=jnp.int32)
    real_positions = (jnp.arange(S)[None, :] < lengths[:, None]).astype(jnp.float32)

    # Pack weights ONCE (transpose, gate reorder i,f,o,g, bias fold, bf16 cast).
    wih_p, whh_p, bias_p = pack_lstm_params(w_ih, w_hh, b_ih, b_hh)

    out = compressor1_forward(x, real_positions, wih_p, whh_p, bias_p)
    out = jax.block_until_ready(out)

    ref = compressor1_reference(x, real_positions, w_ih, w_hh, b_ih, b_hh)
    assert out.shape == (B, H)
    # bf16 input-projection operands with f32 accumulation; recurrence in f32.
    assert jnp.allclose(out, ref, atol=5e-2, rtol=5e-2), "mismatch vs reference"

    print("KERNEL_OK")
</pallas_src>

<mosaic_0001>
module attributes {stable_mosaic.version = 11 : i64} {
  func.func @_lstm_gather_kernel(%arg0: i32, %arg1: memref<8x1xi32, #tpu.memory_space<vmem>>, %arg2: memref<1x64x32xbf16, #tpu.memory_space<vmem>>, %arg3: memref<32x128xbf16, #tpu.memory_space<vmem>>, %arg4: memref<32x128xf32, #tpu.memory_space<vmem>>, %arg5: memref<1x128xf32, #tpu.memory_space<vmem>>, %arg6: memref<8x32xf32, #tpu.memory_space<vmem>>, %arg7: memref<64x128xf32, #tpu.memory_space<vmem>>) attributes {dimension_semantics = [#tpu.dimension_semantics<parallel>], iteration_bounds = array<i64: 1>, scalar_prefetch = 0 : i64, scratch_operands = 1 : i64, tpu.core_type = #tpu.core_type<tc>, window_params = [{transform_indices = @transform_0, window_bounds = array<i64: 8, 1>}, {transform_indices = @transform_1, window_bounds = array<i64: 1, 64, 32>}, {pipeline_mode = #tpu.pipeline_mode<synchronous>, transform_indices = @transform_2, window_bounds = array<i64: 32, 128>}, {pipeline_mode = #tpu.pipeline_mode<synchronous>, transform_indices = @transform_3, window_bounds = array<i64: 32, 128>}, {pipeline_mode = #tpu.pipeline_mode<synchronous>, transform_indices = @transform_4, window_bounds = array<i64: 1, 128>}, {transform_indices = @transform_5, window_bounds = array<i64: 8, 32>}]} {
    %c0 = arith.constant 0 : index
    %c0_0 = arith.constant 0 : index
    %c0_1 = arith.constant 0 : index
    %0 = vector.load %arg2[%c0, %c0_0, %c0_1] : memref<1x64x32xbf16, #tpu.memory_space<vmem>>, vector<1x64x32xbf16>
    %1 = vector.shape_cast %0 : vector<1x64x32xbf16> to vector<64x32xbf16>
    %c0_2 = arith.constant 0 : index
    %c0_3 = arith.constant 0 : index
    %2 = vector.load %arg3[%c0_2, %c0_3] : memref<32x128xbf16, #tpu.memory_space<vmem>>, vector<32x128xbf16>
    %cst = arith.constant dense<0.000000e+00> : vector<64x128xf32>
    %3 = tpu.matmul %1, %2, %cst {dimension_numbers = #tpu.dot_dimension_numbers<[1], [0], [0], [1], [0, 0, 1, 1], [], []>} : vector<64x32xbf16>, vector<32x128xbf16>, vector<64x128xf32> -> vector<64x128xf32>
    %c0_4 = arith.constant 0 : index
    %c0_5 = arith.constant 0 : index
    %4 = vector.load %arg5[%c0_4, %c0_5] : memref<1x128xf32, #tpu.memory_space<vmem>>, vector<1x128xf32>
    %5 = vector.broadcast %4 : vector<1x128xf32> to vector<64x128xf32>
    %6 = arith.addf %3, %5 : vector<64x128xf32>
    %c0_6 = arith.constant 0 : index
    %c0_7 = arith.constant 0 : index
    %7 = vector.load %arg7[%c0_6, %c0_7] : memref<64x128xf32, #tpu.memory_space<vmem>>, vector<64x128xf32>
    tpu.vector_store %arg7[%c0_6, %c0_7], %6 {strides = array<i32>} : memref<64x128xf32, #tpu.memory_space<vmem>>, vector<64x128xf32>,
    %c0_8 = arith.constant 0 : index
    %c0_9 = arith.constant 0 : index
    %8 = vector.load %arg4[%c0_8, %c0_9] : memref<32x128xf32, #tpu.memory_space<vmem>>, vector<32x128xf32>
    %c0_10 = arith.constant 0 : index
    %c0_11 = arith.constant 0 : index
    %9 = vector.load %arg1[%c0_10, %c0_11] : memref<8x1xi32, #tpu.memory_space<vmem>>, vector<8x1xi32>
    %10 = tpu.iota {dimensions = array<i32: 1>} : vector<8x128xi32>
    %c96_i32 = arith.constant 96 : i32
    %11 = vector.broadcast %c96_i32 : i32 to vector<8x128xi32>
    %12 = arith.cmpi slt, %10, %11 : vector<8x128xi32>
    %cst_12 = arith.constant 0.000000e+00 : f32
    %13 = vector.broadcast %cst_12 : f32 to vector<8x32xf32>
    %c0_i32 = arith.constant 0 : i32
    %c8_i32 = arith.constant 8 : i32
    %14 = arith.muli %c0_i32, %c8_i32 : i32
    %15 = tpu.assume_multiple %14, 8 : i32
    %cst_13 = arith.constant dense<0.000000e+00> : vector<8x128xf32>
    %16 = tpu.matmul %13, %8, %cst_13 {dimension_numbers = #tpu.dot_dimension_numbers<[1], [0], [0], [1], [0, 0, 1, 1], [], []>} : vector<8x32xf32>, vector<32x128xf32>, vector<8x128xf32> -> vector<8x128xf32>
    %17 = arith.index_cast %15 : i32 to index
    %c0_14 = arith.constant 0 : index
    %18 = vector.load %arg7[%17, %c0_14] : memref<64x128xf32, #tpu.memory_space<vmem>>, vector<8x128xf32>
    %19 = arith.addf %16, %18 : vector<8x128xf32>
    %20 = arith.negf %19 : vector<8x128xf32>
    %21 = math.exp %20 : vector<8x128xf32>
    %cst_15 = arith.constant 1.000000e+00 : f32
    %22 = vector.broadcast %cst_15 : f32 to vector<8x128xf32>
    %23 = arith.addf %22, %21 : vector<8x128xf32>
    %24 = arith.divf %22, %23 : vector<8x128xf32>
    %25 = math.tanh %19 : vector<8x128xf32>
    %26 = arith.select %12, %24, %25 : vector<8x128xi1>, vector<8x128xf32>
    %27 = vector.extract_strided_slice %26 {offsets = [0, 0], sizes = [8, 32], strides = [1, 1]} : vector<8x128xf32> to vector<8x32xf32>
    %28 = vector.extract_strided_slice %26 {offsets = [0, 32], sizes = [8, 32], strides = [1, 1]} : vector<8x128xf32> to vector<8x32xf32>
    %29 = vector.extract_strided_slice %26 {offsets = [0, 64], sizes = [8, 32], strides = [1, 1]} : vector<8x128xf32> to vector<8x32xf32>
    %30 = vector.extract_strided_slice %26 {offsets = [0, 96], sizes = [8, 32], strides = [1, 1]} : vector<8x128xf32> to vector<8x32xf32>
    %31 = arith.mulf %28, %13 : vector<8x32xf32>
    %32 = arith.mulf %27, %30 : vector<8x32xf32>
    %33 = arith.addf %31, %32 : vector<8x32xf32>
    %34 = math.tanh %33 : vector<8x32xf32>
    %35 = arith.mulf %29, %34 : vector<8x32xf32>
    %36 = vector.broadcast %c0_i32 : i32 to vector<8x1xi32>
    %37 = arith.cmpi eq, %9, %36 : vector<8x1xi32>
    %38 = vector.shape_cast %37 : vector<8x1xi1> to vector<8x1xi1>
    %39 = vector.broadcast %38 : vector<8x1xi1> to vector<8x32xi1>
    %40 = arith.select %39, %35, %13 : vector<8x32xi1>, vector<8x32xf32>
    %c1_i32 = arith.constant 1 : i32
    %c8_i32_16 = arith.constant 8 : i32
    %41 = arith.muli %c1_i32, %c8_i32_16 : i32
    %42 = tpu.assume_multiple %41, 8 : i32
    %cst_17 = arith.constant dense<0.000000e+00> : vector<8x128xf32>
    %43 = tpu.matmul %35, %8, %cst_17 {dimension_numbers = #tpu.dot_dimension_numbers<[1], [0], [0], [1], [0, 0, 1, 1], [], []>} : vector<8x32xf32>, vector<32x128xf32>, vector<8x128xf32> -> vector<8x128xf32>
    %44 = arith.index_cast %42 : i32 to index
    %c0_18 = arith.constant 0 : index
    %45 = vector.load %arg7[%44, %c0_18] : memref<64x128xf32, #tpu.memory_space<vmem>>, vector<8x128xf32>
    %46 = arith.addf %43, %45 : vector<8x128xf32>
    %47 = arith.negf %46 : vector<8x128xf32>
    %48 = math.exp %47 : vector<8x128xf32>
    %cst_19 = arith.constant 1.000000e+00 : f32
    %49 = vector.broadcast %cst_19 : f32 to vector<8x128xf32>
    %50 = arith.addf %49, %48 : vector<8x128xf32>
    %51 = arith.divf %49, %50 : vector<8x128xf32>
    %52 = math.tanh %46 : vector<8x128xf32>
    %53 = arith.select %12, %51, %52 : vector<8x128xi1>, vector<8x128xf32>
    %54 = vector.extract_strided_slice %53 {offsets = [0, 0], sizes = [8, 32], strides = [1, 1]} : vector<8x128xf32> to vector<8x32xf32>
    %55 = vector.extract_strided_slice %53 {offsets = [0, 32], sizes = [8, 32], strides = [1, 1]} : vector<8x128xf32> to vector<8x32xf32>
    %56 = vector.extract_strided_slice %53 {offsets = [0, 64], sizes = [8, 32], strides = [1, 1]} : vector<8x128xf32> to vector<8x32xf32>
    %57 = vector.extract_strided_slice %53 {offsets = [0, 96], sizes = [8, 32], strides = [1, 1]} : vector<8x128xf32> to vector<8x32xf32>
    %58 = arith.mulf %55, %33 : vector<8x32xf32>
    %59 = arith.mulf %54, %57 : vector<8x32xf32>
    %60 = arith.addf %58, %59 : vector<8x32xf32>
    %61 = math.tanh %60 : vector<8x32xf32>
    %62 = arith.mulf %56, %61 : vector<8x32xf32>
    %63 = vector.broadcast %c1_i32 : i32 to vector<8x1xi32>
    %64 = arith.cmpi eq, %9, %63 : vector<8x1xi32>
    %65 = vector.shape_cast %64 : vector<8x1xi1> to vector<8x1xi1>
    %66 = vector.broadcast %65 : vector<8x1xi1> to vector<8x32xi1>
    %67 = arith.select %66, %62, %40 : vector<8x32xi1>, vector<8x32xf32>
    %c2_i32 = arith.constant 2 : i32
    %c8_i32_20 = arith.constant 8 : i32
    %68 = arith.muli %c2_i32, %c8_i32_20 : i32
    %69 = tpu.assume_multiple %68, 8 : i32
    %cst_21 = arith.constant dense<0.000000e+00> : vector<8x128xf32>
    %70 = tpu.matmul %62, %8, %cst_21 {dimension_numbers = #tpu.dot_dimension_numbers<[1], [0], [0], [1], [0, 0, 1, 1], [], []>} : vector<8x32xf32>, vector<32x128xf32>, vector<8x128xf32> -> vector<8x128xf32>
    %71 = arith.index_cast %69 : i32 to index
    %c0_22 = arith.constant 0 : index
    %72 = vector.load %arg7[%71, %c0_22] : memref<64x128xf32, #tpu.memory_space<vmem>>, vector<8x128xf32>
    %73 = arith.addf %70, %72 : vector<8x128xf32>
    %74 = arith.negf %73 : vector<8x128xf32>
    %75 = math.exp %74 : vector<8x128xf32>
    %cst_23 = arith.constant 1.000000e+00 : f32
    %76 = vector.broadcast %cst_23 : f32 to vector<8x128xf32>
    %77 = arith.addf %76, %75 : vector<8x128xf32>
    %78 = arith.divf %76, %77 : vector<8x128xf32>
    %79 = math.tanh %73 : vector<8x128xf32>
    %80 = arith.select %12, %78, %79 : vector<8x128xi1>, vector<8x128xf32>
    %81 = vector.extract_strided_slice %80 {offsets = [0, 0], sizes = [8, 32], strides = [1, 1]} : vector<8x128xf32> to vector<8x32xf32>
    %82 = vector.extract_strided_slice %80 {offsets = [0, 32], sizes = [8, 32], strides = [1, 1]} : vector<8x128xf32> to vector<8x32xf32>
    %83 = vector.extract_strided_slice %80 {offsets = [0, 64], sizes = [8, 32], strides = [1, 1]} : vector<8x128xf32> to vector<8x32xf32>
    %84 = vector.extract_strided_slice %80 {offsets = [0, 96], sizes = [8, 32], strides = [1, 1]} : vector<8x128xf32> to vector<8x32xf32>
    %85 = arith.mulf %82, %60 : vector<8x32xf32>
    %86 = arith.mulf %81, %84 : vector<8x32xf32>
    %87 = arith.addf %85, %86 : vector<8x32xf32>
    %88 = math.tanh %87 : vector<8x32xf32>
    %89 = arith.mulf %83, %88 : vector<8x32xf32>
    %90 = vector.broadcast %c2_i32 : i32 to vector<8x1xi32>
    %91 = arith.cmpi eq, %9, %90 : vector<8x1xi32>
    %92 = vector.shape_cast %91 : vector<8x1xi1> to vector<8x1xi1>
    %93 = vector.broadcast %92 : vector<8x1xi1> to vector<8x32xi1>
    %94 = arith.select %93, %89, %67 : vector<8x32xi1>, vector<8x32xf32>
    %c3_i32 = arith.constant 3 : i32
    %c8_i32_24 = arith.constant 8 : i32
    %95 = arith.muli %c3_i32, %c8_i32_24 : i32
    %96 = tpu.assume_multiple %95, 8 : i32
    %cst_25 = arith.constant dense<0.000000e+00> : vector<8x128xf32>
    %97 = tpu.matmul %89, %8, %cst_25 {dimension_numbers = #tpu.dot_dimension_numbers<[1], [0], [0], [1], [0, 0, 1, 1], [], []>} : vector<8x32xf32>, vector<32x128xf32>, vector<8x128xf32> -> vector<8x128xf32>
    %98 = arith.index_cast %96 : i32 to index
    %c0_26 = arith.constant 0 : index
    %99 = vector.load %arg7[%98, %c0_26] : memref<64x128xf32, #tpu.memory_space<vmem>>, vector<8x128xf32>
    %100 = arith.addf %97, %99 : vector<8x128xf32>
    %101 = arith.negf %100 : vector<8x128xf32>
    %102 = math.exp %101 : vector<8x128xf32>
    %cst_27 = arith.constant 1.000000e+00 : f32
    %103 = vector.broadcast %cst_27 : f32 to vector<8x128xf32>
    %104 = arith.addf %103, %102 : vector<8x128xf32>
    %105 = arith.divf %103, %104 : vector<8x128xf32>
    %106 = math.tanh %100 : vector<8x128xf32>
    %107 = arith.select %12, %105, %106 : vector<8x128xi1>, vector<8x128xf32>
    %108 = vector.extract_strided_slice %107 {offsets = [0, 0], sizes = [8, 32], strides = [1, 1]} : vector<8x128xf32> to vector<8x32xf32>
    %109 = vector.extract_strided_slice %107 {offsets = [0, 32], sizes = [8, 32], strides = [1, 1]} : vector<8x128xf32> to vector<8x32xf32>
    %110 = vector.extract_strided_slice %107 {offsets = [0, 64], sizes = [8, 32], strides = [1, 1]} : vector<8x128xf32> to vector<8x32xf32>
    %111 = vector.extract_strided_slice %107 {offsets = [0, 96], sizes = [8, 32], strides = [1, 1]} : vector<8x128xf32> to vector<8x32xf32>
    %112 = arith.mulf %109, %87 : vector<8x32xf32>
    %113 = arith.mulf %108, %111 : vector<8x32xf32>
    %114 = arith.addf %112, %113 : vector<8x32xf32>
    %115 = math.tanh %114 : vector<8x32xf32>
    %116 = arith.mulf %110, %115 : vector<8x32xf32>
    %117 = vector.broadcast %c3_i32 : i32 to vector<8x1xi32>
    %118 = arith.cmpi eq, %9, %117 : vector<8x1xi32>
    %119 = vector.shape_cast %118 : vector<8x1xi1> to vector<8x1xi1>
    %120 = vector.broadcast %119 : vector<8x1xi1> to vector<8x32xi1>
    %121 = arith.select %120, %116, %94 : vector<8x32xi1>, vector<8x32xf32>
    %c4_i32 = arith.constant 4 : i32
    %c8_i32_28 = arith.constant 8 : i32
    %122 = arith.muli %c4_i32, %c8_i32_28 : i32
    %123 = tpu.assume_multiple %122, 8 : i32
    %cst_29 = arith.constant dense<0.000000e+00> : vector<8x128xf32>
    %124 = tpu.matmul %116, %8, %cst_29 {dimension_numbers = #tpu.dot_dimension_numbers<[1], [0], [0], [1], [0, 0, 1, 1], [], []>} : vector<8x32xf32>, vector<32x128xf32>, vector<8x128xf32> -> vector<8x128xf32>
    %125 = arith.index_cast %123 : i32 to index
    %c0_30 = arith.constant 0 : index
    %126 = vector.load %arg7[%125, %c0_30] : memref<64x128xf32, #tpu.memory_space<vmem>>, vector<8x128xf32>
    %127 = arith.addf %124, %126 : vector<8x128xf32>
    %128 = arith.negf %127 : vector<8x128xf32>
    %129 = math.exp %128 : vector<8x128xf32>
    %cst_31 = arith.constant 1.000000e+00 : f32
    %130 = vector.broadcast %cst_31 : f32 to vector<8x128xf32>
    %131 = arith.addf %130, %129 : vector<8x128xf32>
    %132 = arith.divf %130, %131 : vector<8x128xf32>
    %133 = math.tanh %127 : vector<8x128xf32>
    %134 = arith.select %12, %132, %133 : vector<8x128xi1>, vector<8x128xf32>
    %135 = vector.extract_strided_slice %134 {offsets = [0, 0], sizes = [8, 32], strides = [1, 1]} : vector<8x128xf32> to vector<8x32xf32>
    %136 = vector.extract_strided_slice %134 {offsets = [0, 32], sizes = [8, 32], strides = [1, 1]} : vector<8x128xf32> to vector<8x32xf32>
    %137 = vector.extract_strided_slice %134 {offsets = [0, 64], sizes = [8, 32], strides = [1, 1]} : vector<8x128xf32> to vector<8x32xf32>
    %138 = vector.extract_strided_slice %134 {offsets = [0, 96], sizes = [8, 32], strides = [1, 1]} : vector<8x128xf32> to vector<8x32xf32>
    %139 = arith.mulf %136, %114 : vector<8x32xf32>
    %140 = arith.mulf %135, %138 : vector<8x32xf32>
    %141 = arith.addf %139, %140 : vector<8x32xf32>
    %142 = math.tanh %141 : vector<8x32xf32>
    %143 = arith.mulf %137, %142 : vector<8x32xf32>
    %144 = vector.broadcast %c4_i32 : i32 to vector<8x1xi32>
    %145 = arith.cmpi eq, %9, %144 : vector<8x1xi32>
    %146 = vector.shape_cast %145 : vector<8x1xi1> to vector<8x1xi1>
    %147 = vector.broadcast %146 : vector<8x1xi1> to vector<8x32xi1>
    %148 = arith.select %147, %143, %121 : vector<8x32xi1>, vector<8x32xf32>
    %c5_i32 = arith.constant 5 : i32
    %c8_i32_32 = arith.constant 8 : i32
    %149 = arith.muli %c5_i32, %c8_i32_32 : i32
    %150 = tpu.assume_multiple %149, 8 : i32
    %cst_33 = arith.constant dense<0.000000e+00> : vector<8x128xf32>
    %151 = tpu.matmul %143, %8, %cst_33 {dimension_numbers = #tpu.dot_dimension_numbers<[1], [0], [0], [1], [0, 0, 1, 1], [], []>} : vector<8x32xf32>, vector<32x128xf32>, vector<8x128xf32> -> vector<8x128xf32>
    %152 = arith.index_cast %150 : i32 to index
    %c0_34 = arith.constant 0 : index
    %153 = vector.load %arg7[%152, %c0_34] : memref<64x128xf32, #tpu.memory_space<vmem>>, vector<8x128xf32>
    %154 = arith.addf %151, %153 : vector<8x128xf32>
    %155 = arith.negf %154 : vector<8x128xf32>
    %156 = math.exp %155 : vector<8x128xf32>
    %cst_35 = arith.constant 1.000000e+00 : f32
    %157 = vector.broadcast %cst_35 : f32 to vector<8x128xf32>
    %158 = arith.addf %157, %156 : vector<8x128xf32>
    %159 = arith.divf %157, %158 : vector<8x128xf32>
    %160 = math.tanh %154 : vector<8x128xf32>
    %161 = arith.select %12, %159, %160 : vector<8x128xi1>, vector<8x128xf32>
    %162 = vector.extract_strided_slice %161 {offsets = [0, 0], sizes = [8, 32], strides = [1, 1]} : vector<8x128xf32> to vector<8x32xf32>
    %163 = vector.extract_strided_slice %161 {offsets = [0, 32], sizes = [8, 32], strides = [1, 1]} : vector<8x128xf32> to vector<8x32xf32>
    %164 = vector.extract_strided_slice %161 {offsets = [0, 64], sizes = [8, 32], strides = [1, 1]} : vector<8x128xf32> to vector<8x32xf32>
    %165 = vector.extract_strided_slice %161 {offsets = [0, 96], sizes = [8, 32], strides = [1, 1]} : vector<8x128xf32> to vector<8x32xf32>
    %166 = arith.mulf %163, %141 : vector<8x32xf32>
    %167 = arith.mulf %162, %165 : vector<8x32xf32>
    %168 = arith.addf %166, %167 : vector<8x32xf32>
    %169 = math.tanh %168 : vector<8x32xf32>
    %170 = arith.mulf %164, %169 : vector<8x32xf32>
    %171 = vector.broadcast %c5_i32 : i32 to vector<8x1xi32>
    %172 = arith.cmpi eq, %9, %171 : vector<8x1xi32>
    %173 = vector.shape_cast %172 : vector<8x1xi1> to vector<8x1xi1>
    %174 = vector.broadcast %173 : vector<8x1xi1> to vector<8x32xi1>
    %175 = arith.select %174, %170, %148 : vector<8x32xi1>, vector<8x32xf32>
    %c6_i32 = arith.constant 6 : i32
    %c8_i32_36 = arith.constant 8 : i32
    %176 = arith.muli %c6_i32, %c8_i32_36 : i32
    %177 = tpu.assume_multiple %176, 8 : i32
    %cst_37 = arith.constant dense<0.000000e+00> : vector<8x128xf32>
    %178 = tpu.matmul %170, %8, %cst_37 {dimension_numbers = #tpu.dot_dimension_numbers<[1], [0], [0], [1], [0, 0, 1, 1], [], []>} : vector<8x32xf32>, vector<32x128xf32>, vector<8x128xf32> -> vector<8x128xf32>
    %179 = arith.index_cast %177 : i32 to index
    %c0_38 = arith.constant 0 : index
    %180 = vector.load %arg7[%179, %c0_38] : memref<64x128xf32, #tpu.memory_space<vmem>>, vector<8x128xf32>
    %181 = arith.addf %178, %180 : vector<8x128xf32>
    %182 = arith.negf %181 : vector<8x128xf32>
    %183 = math.exp %182 : vector<8x128xf32>
    %cst_39 = arith.constant 1.000000e+00 : f32
    %184 = vector.broadcast %cst_39 : f32 to vector<8x128xf32>
    %185 = arith.addf %184, %183 : vector<8x128xf32>
    %186 = arith.divf %184, %185 : vector<8x128xf32>
    %187 = math.tanh %181 : vector<8x128xf32>
    %188 = arith.select %12, %186, %187 : vector<8x128xi1>, vector<8x128xf32>
    %189 = vector.extract_strided_slice %188 {offsets = [0, 0], sizes = [8, 32], strides = [1, 1]} : vector<8x128xf32> to vector<8x32xf32>
    %190 = vector.extract_strided_slice %188 {offsets = [0, 32], sizes = [8, 32], strides = [1, 1]} : vector<8x128xf32> to vector<8x32xf32>
    %191 = vector.extract_strided_slice %188 {offsets = [0, 64], sizes = [8, 32], strides = [1, 1]} : vector<8x128xf32> to vector<8x32xf32>
    %192 = vector.extract_strided_slice %188 {offsets = [0, 96], sizes = [8, 32], strides = [1, 1]} : vector<8x128xf32> to vector<8x32xf32>
    %193 = arith.mulf %190, %168 : vector<8x32xf32>
    %194 = arith.mulf %189, %192 : vector<8x32xf32>
    %195 = arith.addf %193, %194 : vector<8x32xf32>
    %196 = math.tanh %195 : vector<8x32xf32>
    %197 = arith.mulf %191, %196 : vector<8x32xf32>
    %198 = vector.broadcast %c6_i32 : i32 to vector<8x1xi32>
    %199 = arith.cmpi eq, %9, %198 : vector<8x1xi32>
    %200 = vector.shape_cast %199 : vector<8x1xi1> to vector<8x1xi1>
    %201 = vector.broadcast %200 : vector<8x1xi1> to vector<8x32xi1>
    %202 = arith.select %201, %197, %175 : vector<8x32xi1>, vector<8x32xf32>
    %c7_i32 = arith.constant 7 : i32
    %c8_i32_40 = arith.constant 8 : i32
    %203 = arith.muli %c7_i32, %c8_i32_40 : i32
    %204 = tpu.assume_multiple %203, 8 : i32
    %cst_41 = arith.constant dense<0.000000e+00> : vector<8x128xf32>
    %205 = tpu.matmul %197, %8, %cst_41 {dimension_numbers = #tpu.dot_dimension_numbers<[1], [0], [0], [1], [0, 0, 1, 1], [], []>} : vector<8x32xf32>, vector<32x128xf32>, vector<8x128xf32> -> vector<8x128xf32>
    %206 = arith.index_cast %204 : i32 to index
    %c0_42 = arith.constant 0 : index
    %207 = vector.load %arg7[%206, %c0_42] : memref<64x128xf32, #tpu.memory_space<vmem>>, vector<8x128xf32>
    %208 = arith.addf %205, %207 : vector<8x128xf32>
    %209 = arith.negf %208 : vector<8x128xf32>
    %210 = math.exp %209 : vector<8x128xf32>
    %cst_43 = arith.constant 1.000000e+00 : f32
    %211 = vector.broadcast %cst_43 : f32 to vector<8x128xf32>
    %212 = arith.addf %211, %210 : vector<8x128xf32>
    %213 = arith.divf %211, %212 : vector<8x128xf32>
    %214 = math.tanh %208 : vector<8x128xf32>
    %215 = arith.select %12, %213, %214 : vector<8x128xi1>, vector<8x128xf32>
    %216 = vector.extract_strided_slice %215 {offsets = [0, 0], sizes = [8, 32], strides = [1, 1]} : vector<8x128xf32> to vector<8x32xf32>
    %217 = vector.extract_strided_slice %215 {offsets = [0, 32], sizes = [8, 32], strides = [1, 1]} : vector<8x128xf32> to vector<8x32xf32>
    %218 = vector.extract_strided_slice %215 {offsets = [0, 64], sizes = [8, 32], strides = [1, 1]} : vector<8x128xf32> to vector<8x32xf32>
    %219 = vector.extract_strided_slice %215 {offsets = [0, 96], sizes = [8, 32], strides = [1, 1]} : vector<8x128xf32> to vector<8x32xf32>
    %220 = arith.mulf %217, %195 : vector<8x32xf32>
    %221 = arith.mulf %216, %219 : vector<8x32xf32>
    %222 = arith.addf %220, %221 : vector<8x32xf32>
    %223 = math.tanh %222 : vector<8x32xf32>
    %224 = arith.mulf %218, %223 : vector<8x32xf32>
    %225 = vector.broadcast %c7_i32 : i32 to vector<8x1xi32>
    %226 = arith.cmpi eq, %9, %225 : vector<8x1xi32>
    %227 = vector.shape_cast %226 : vector<8x1xi1> to vector<8x1xi1>
    %228 = vector.broadcast %227 : vector<8x1xi1> to vector<8x32xi1>
    %229 = arith.select %228, %224, %202 : vector<8x32xi1>, vector<8x32xf32>
    %c8_i32_44 = arith.constant 8 : i32
    %c0_45 = arith.constant 0 : index
    %c0_46 = arith.constant 0 : index
    %230 = vector.load %arg6[%c0_45, %c0_46] : memref<8x32xf32, #tpu.memory_space<vmem>>, vector<8x32xf32>
    tpu.vector_store %arg6[%c0_45, %c0_46], %229 {strides = array<i32>} : memref<8x32xf32, #tpu.memory_space<vmem>>, vector<8x32xf32>,
    return
  }
  func.func @transform_0(%arg0: i32) -> (i32, i32) {
    %c0_i32 = arith.constant 0 : i32
    %c0_i32_0 = arith.constant 0 : i32
    return %arg0, %c0_i32 : i32, i32
  }
  func.func @transform_1(%arg0: i32) -> (i32, i32, i32) {
    %c0_i32 = arith.constant 0 : i32
    %c0_i32_0 = arith.constant 0 : i32
    %c0_i32_1 = arith.constant 0 : i32
    return %arg0, %c0_i32, %c0_i32_0 : i32, i32, i32
  }
  func.func @transform_2(%arg0: i32) -> (i32, i32) {
    %c0_i32 = arith.constant 0 : i32
    %c0_i32_0 = arith.constant 0 : i32
    %c0_i32_1 = arith.constant 0 : i32
    return %c0_i32, %c0_i32_0 : i32, i32
  }
  func.func @transform_3(%arg0: i32) -> (i32, i32) {
    %c0_i32 = arith.constant 0 : i32
    %c0_i32_0 = arith.constant 0 : i32
    %c0_i32_1 = arith.constant 0 : i32
    return %c0_i32, %c0_i32_0 : i32, i32
  }
  func.func @transform_4(%arg0: i32) -> (i32, i32) {
    %c0_i32 = arith.constant 0 : i32
    %c0_i32_0 = arith.constant 0 : i32
    %c0_i32_1 = arith.constant 0 : i32
    return %c0_i32, %c0_i32_0 : i32, i32
  }
  func.func @transform_5(%arg0: i32) -> (i32, i32) {
    %c0_i32 = arith.constant 0 : i32
    %c0_i32_0 = arith.constant 0 : i32
    return %arg0, %c0_i32 : i32, i32
  }
}

</mosaic_0001>

<bundles_post_ra>
// kernel: compressor1_forward.1
= control target key start
LH: loop header
LB: loop body
LE: loop exit
PB: predicated region body
PF: predicated region fallthrough
CT: control target
= control target key end

     0   :  { %v1293_v1 = vmov 0.0   ;;  %vm1294_vm0 = vmmov 0   ;;  %vm72_vm1 = vcmask 261120   ;;  %v163_v19 = vlaneseq  ;;  %s1296_s9 = smov 64   ;;  %s1575_s2 = inlined_call_operand.vmem [shape: bf16[32,128], index: 2, kind: input, shape index: {}]   ;;  %s1576_s3 = inlined_call_operand.vmem [shape: f32[32,128], index: 3, kind: input, shape index: {}]   ;;  %s1577_s1 = inlined_call_operand.vmem [shape: bf16[1,64,32], index: 1, kind: input, shape index: {}]   ;;  %s1578_s4 = inlined_call_operand.vmem [shape: f32[1,128], index: 4, kind: input, shape index: {}]   ;;  %s1579_s0 = inlined_call_operand.vmem [shape: s32[8,1], index: 0, kind: input, shape index: {}]   ;;  %s1580_s5 = inlined_call_operand.vmem [shape: f32[8,32], index: 5, kind: output, shape index: {}]  }
   0x1   :  { %v1223_v0 = vld [vmem:[%s1575_s2 + $0x8] sm:$0xff]   ;;  %1128 = vmatprep.subr.mxu1 %v1293_v1  ;;  %1136 = vmatprep.mubr.msk.f32.mxu1 %vm1294_vm0, %v1293_v1  ;;  %v1337_v2 = vld [vmem:[%s1576_s3 + $0x18] sm:$0xff]  ;;  %v1224_v3 = vld [vmem:[%s1575_s2] sm:$0xff]  }
   0x2   :  { %1116 = vmatprep.subr.bf16.mxu0 %v1223_v0  ;;  %1129 = vmatpush3.msra.mxu1 %v1337_v2  ;;  %v1346_v4 = vld [vmem:[%s1576_s3 + $0x10] sm:$0xff]  ;;  %v1225_v5 = vld [vmem:[%s1577_s1] sm:$0xff]   ;;  %v1355_v6 = vld [vmem:[%s1576_s3 + $0x8] sm:$0xff]  ;;  %v1401_v20 = vand.u32 127, %v163_v19 }
   0x3   :  { %1117 = vmatpush3.bf16.msra.mxu0 %v1223_v0  ;;  %1130 = vmatprep.subr.mxu1 %v1293_v1  ;;  %v1363_v7 = vld [vmem:[%s1576_s3] sm:$0xff]  ;;  %v1226_v8 = vld [vmem:[%s1577_s1 + $0x8] sm:$0xff]   ;;  %v1227_v50 = vld [vmem:[%s1577_s1 + $0x10] sm:$0xff]  }
   0x4   :  { %1118 = vmatprep.subr.bf16.mxu0 %v1224_v3  ;;  %1131 = vmatpush3.msra.mxu1 %v1346_v4  ;;  %v1398_v12 = vld [vmem:[%s1578_s4] ss:$0 sm:$0xff]  ;;  %vm165_vm2 = vcmp.lt.s32.totalorder %v1401_v20, 96  ;;  %s1295_s4 = smov 32   ;;  %v1228_v51 = vld [vmem:[%s1577_s1 + $0x18] sm:$0xff]  }
   0x5   :  { %1132 = vmatprep.subr.mxu1 %v1293_v1  ;;  %1120 = vmatprep.mubr.msk.bf16.mxu0 %vm72_vm1, %v1225_v5 }
   0x6   :  { %1133 = vmatpush3.msra.mxu1 %v1355_v6 }
   0x7   :  { %1119 = vmatpush3.bf16.msra.mxu0 %v1224_v3  ;;  %1134 = vmatprep.subr.mxu1 %v1293_v1 }
   0x8   :  { %1135 = vmatpush3.msra.mxu1 %v1363_v7  ;;  %1150 = vmatprep.subr.mxu0 %v1293_v1 }
   0x9   :  { %1137 = vmatmul.mubr.f32.vlgmr.msra.gmra.mxu1 %v1293_v1  ;;  %1139 = vmatprep.subr.mxu1 %v1293_v1 }
   0xa   :  { %1121 = vmatmul.mubr.msk.bf16.vlgmr.msra.gmra.mxu0 %vm72_vm1, %v1226_v8  ;;  %1140 = vmatpush3.msra.mxu1 %v1337_v2 }
   0xb   :  { %1141 = vmatprep.subr.mxu1 %v1293_v1  ;;  %1147 = vmatprep.mubr.msk.f32.mxu1 %vm1294_vm0, %v1293_v1 }
   0xc   :  { %1142 = vmatpush3.msra.mxu1 %v1346_v4  ;;  %1151 = vmatpush3.msra.mxu0 %v1337_v2 }
   0xd   :  { %1143 = vmatprep.subr.mxu1 %v1293_v1  ;;  %1152 = vmatprep.subr.mxu0 %v1293_v1 }
   0xe   :  { %1144 = vmatpush3.msra.mxu1 %v1355_v6  ;;  %1153 = vmatpush3.msra.mxu0 %v1346_v4 }
   0xf   :  { %1145 = vmatprep.subr.mxu1 %v1293_v1  ;;  %1154 = vmatprep.subr.mxu0 %v1293_v1 }
  0x10   :  { %1146 = vmatpush3.msra.mxu1 %v1363_v7  ;;  %1155 = vmatpush3.msra.mxu0 %v1355_v6 }
  0x11   :  { %1156 = vmatprep.subr.mxu0 %v1293_v1  ;;  %1161 = vmatprep.subr.mxu1 %v1293_v1 }
  0x12   :  { %1157 = vmatpush3.msra.mxu0 %v1363_v7  ;;  %1124 = vmatprep.mubr.msk.bf16.mxu0 %vm72_vm1, %v1227_v50 }
  0x13   :  { %1172 = vmatprep.subr.mxu0 %v1293_v1  ;;  %1125 = vmatmul.mubr.msk.bf16.gmra.mxu0 %vm72_vm1, %v1228_v51 }
  0x14   :  { %1158 = vmatprep.mubr.msk.f32.mxu0 %vm1294_vm0, %v1293_v1 }
  0xc9   :  { %v236_v9 = vpop.f32.mrf.mxu1 }
  0xca   :  { %v1393_v10 = vpop.f32.mrf.mxu0 }
  0xcb   :  { %v1138_v11 = vpop.f32.mrf.mxu1  ;;  %v128_v60 = vadd.f32 %v1393_v10, %v1398_v12 }
  0xcc   :  { %v119_v13 = vpop.f32.mrf.mxu0 }
  0xcd   :  { %v120_v14 = vadd.f32 %v1398_v12, %v119_v13 }
  0xce   :  { %v1424_v33 = vpop.f32.mrf.mxu0 }
  0xcf   :  { %v237_v15 = vadd.f32 %v236_v9, %v120_v14 }
  0xd0   :  { %v122_v34 = vpop.f32.mrf.mxu0 }
  0xd1   :  { %v1055_v16 = vmul.f32 -1.442695, %v237_v15  ;;  %v123_v35 = vadd.f32 %v1398_v12, %v122_v34 }
  0xd3   :  { %1229 = vpow2.f32 %v1055_v16  ;;  %v1457_v56 = vpop.f32.mrf.mxu0 }
  0xd4   :  { %1231 = vtanh.f32 %v237_v15 }
  0xd5   :  { %v1459_v57 = vpop.f32.mrf.mxu0 }
  0xd7   :  { %v1461_v58 = vpop.f32.mrf.mxu0 }
  0xd9   :  { %v1463_v59 = vpop.f32.mrf.mxu0 }
  0xe0   :  { %v1230_v17 = vpop.eup %1229 }
  0xe1   :  { %v243_v18 = vadd.f32 1.0, %v1230_v17  ;;  %v1232_v21 = vpop.eup %1231 }
  0xe3   :  { %1233 = vrcp.f32 %v243_v18 }
  0xf0   :  { %v1234_v22 = vpop.eup %1233 }
  0xf1   :  { %v247_v23 = vsel %vm165_vm2, %v1234_v22, %v1232_v21  ;;  %v131_v22 = vadd.f32 %v1424_v33, %v1398_v12 }
  0xf2   :  { %250 = vrot.lane.b32.xlu0 %v247_v23, %s1295_s4  ;;  %v248_v26 = vmul.f32 0.0, %v247_v23 }
 0x164   :  { %v251_v24 = vpop.permute.xlu0 %250 }
 0x165   :  { %v253_v25 = vmul.f32 %v251_v24, %v247_v23 }
 0x167   :  { %255 = vrot.lane.b32.xlu0 %v253_v25, %s1295_s4 }
 0x1d9   :  { %v256_v27 = vpop.permute.xlu0 %255 }
 0x1da   :  { %v258_v28 = vadd.f32 %v256_v27, %v248_v26 }
 0x1dc   :  { %1235 = vtanh.f32 %v258_v28 }
 0x1e9   :  { %v1236_v29 = vpop.eup %1235 }
 0x1ea   :  { %261 = vrot.lane.b32.xlu1 %v1236_v29, %s1295_s4 }
 0x25c   :  { %v262_v30 = vpop.permute.xlu1 %261 }
 0x25d   :  { %v1409_v31 = vmul.f32 %v262_v30, %v247_v23 }
 0x25f   :  { %275 = vrot.lane.b32.xlu1 %v1409_v31, %s1296_s9 }
 0x2d1   :  { %v276_v32 = vpop.permute.xlu1 %275 }
 0x2d2   :  { %1148 = vmatmul.mubr.msk.f32.vlgmr.msra.gmra.mxu1 %vm72_vm1, %v276_v32 }
 0x2d3   :  { %1162 = vmatpush3.msra.mxu1 %v1337_v2  ;;  %1169 = vmatprep.mubr.msk.f32.mxu1 %vm1294_vm0, %v1293_v1 }
 0x2d4   :  { %1163 = vmatprep.subr.mxu1 %v1293_v1 }
 0x2d5   :  { %1164 = vmatpush3.msra.mxu1 %v1346_v4 }
 0x2d6   :  { %1165 = vmatprep.subr.mxu1 %v1293_v1 }
 0x2d7   :  { %1166 = vmatpush3.msra.mxu1 %v1355_v6 }
 0x2d8   :  { %1167 = vmatprep.subr.mxu1 %v1293_v1 }
 0x2d9   :  { %1168 = vmatpush3.msra.mxu1 %v1363_v7 }
 0x2da   :  { %1183 = vmatprep.subr.mxu1 %v1293_v1 }
 0x392   :  { %v345_v36 = vpop.f32.mrf.mxu1 }
 0x393   :  { %v346_v37 = vadd.f32 %v345_v36, %v123_v35 }
 0x394   :  { %v1149_v38 = vpop.f32.mrf.mxu1 }
 0x395   :  { %v1057_v39 = vmul.f32 -1.442695, %v346_v37 }
 0x397   :  { %1237 = vpow2.f32 %v1057_v39 }
 0x398   :  { %1239 = vtanh.f32 %v346_v37 }
 0x3a4   :  { %v1238_v40 = vpop.eup %1237 }
 0x3a5   :  { %v352_v41 = vadd.f32 1.0, %v1238_v40  ;;  %v1240_v42 = vpop.eup %1239 }
 0x3a7   :  { %1241 = vrcp.f32 %v352_v41 }
 0x3b4   :  { %v1242_v43 = vpop.eup %1241 }
 0x3b5   :  { %v356_v44 = vsel %vm165_vm2, %v1242_v43, %v1240_v42  ;;  %v136_v42 = vadd.f32 %v1398_v12, %v1459_v57 }
 0x3b6   :  { %359 = vrot.lane.b32.xlu0 %v356_v44, %s1295_s4  ;;  %v357_v47 = vmul.f32 %v356_v44, %v258_v28 }
 0x428   :  { %v360_v45 = vpop.permute.xlu0 %359 }
 0x429   :  { %v362_v46 = vmul.f32 %v360_v45, %v356_v44 }
 0x42b   :  { %364 = vrot.lane.b32.xlu1 %v362_v46, %s1295_s4 }
 0x49d   :  { %v365_v48 = vpop.permute.xlu1 %364 }
 0x49e   :  { %v367_v49 = vadd.f32 %v365_v48, %v357_v47 }
 0x4a0   :  { %1243 = vtanh.f32 %v367_v49 }
 0x4ad   :  { %v1244_v52 = vpop.eup %1243 }
 0x4ae   :  { %370 = vrot.lane.b32.xlu0 %v1244_v52, %s1295_s4 }
 0x520   :  { %v371_v53 = vpop.permute.xlu0 %370 }
 0x521   :  { %v1442_v54 = vmul.f32 %v371_v53, %v356_v44 }
 0x523   :  { %384 = vrot.lane.b32.xlu1 %v1442_v54, %s1296_s9 }
 0x595   :  { %v385_v55 = vpop.permute.xlu1 %384 }
 0x596   :  { %1159 = vmatmul.mubr.msk.f32.vlgmr.msra.gmra.mxu0 %vm72_vm1, %v385_v55 }
 0x597   :  { %1173 = vmatpush3.msra.mxu0 %v1337_v2  ;;  %1180 = vmatprep.mubr.msk.f32.mxu0 %vm1294_vm0, %v1293_v1 }
 0x598   :  { %1174 = vmatprep.subr.mxu0 %v1293_v1 }
 0x599   :  { %1175 = vmatpush3.msra.mxu0 %v1346_v4 }
 0x59a   :  { %1176 = vmatprep.subr.mxu0 %v1293_v1 }
 0x59b   :  { %1177 = vmatpush3.msra.mxu0 %v1355_v6 }
 0x59c   :  { %1178 = vmatprep.subr.mxu0 %v1293_v1 }
 0x59d   :  { %1179 = vmatpush3.msra.mxu0 %v1363_v7 }
 0x59e   :  { %1194 = vmatprep.subr.mxu0 %v1293_v1 }
 0x656   :  { %v454_v61 = vpop.f32.mrf.mxu0 }
 0x657   :  { %v455_v62 = vadd.f32 %v454_v61, %v128_v60 }
 0x658   :  { %v1160_v63 = vpop.f32.mrf.mxu0 }
 0x659   :  { %v1059_v0 = vmul.f32 -1.442695, %v455_v62 }
 0x65b   :  { %1245 = vpow2.f32 %v1059_v0 }
 0x65c   :  { %1247 = vtanh.f32 %v455_v62 }
 0x668   :  { %v1246_v3 = vpop.eup %1245 }
 0x669   :  { %v461_v5 = vadd.f32 1.0, %v1246_v3  ;;  %v1248_v8 = vpop.eup %1247  ;;  %v139_v3 = vadd.f32 %v1398_v12, %v1463_v59 }
 0x66b   :  { %1249 = vrcp.f32 %v461_v5 }
 0x678   :  { %v1250_v9 = vpop.eup %1249 }
 0x679   :  { %v465_v11 = vsel %vm165_vm2, %v1250_v9, %v1248_v8 }
 0x67a   :  { %468 = vrot.lane.b32.xlu0 %v465_v11, %s1295_s4  ;;  %v466_v10 = vmul.f32 %v465_v11, %v367_v49 }
 0x6ec   :  { %v469_v13 = vpop.permute.xlu0 %468 }
 0x6ed   :  { %v471_v14 = vmul.f32 %v469_v13, %v465_v11 }
 0x6ef   :  { %473 = vrot.lane.b32.xlu1 %v471_v14, %s1295_s4 }
 0x761   :  { %v474_v15 = vpop.permute.xlu1 %473 }
 0x762   :  { %v476_v16 = vadd.f32 %v474_v15, %v466_v10 }
 0x764   :  { %1251 = vtanh.f32 %v476_v16 }
 0x771   :  { %v1252_v17 = vpop.eup %1251 }
 0x772   :  { %479 = vrot.lane.b32.xlu0 %v1252_v17, %s1295_s4 }
 0x7e4   :  { %v480_v18 = vpop.permute.xlu0 %479 }
 0x7e5   :  { %v1472_v19 = vmul.f32 %v480_v18, %v465_v11 }
 0x7e7   :  { %493 = vrot.lane.b32.xlu1 %v1472_v19, %s1296_s9 }
 0x859   :  { %v494_v21 = vpop.permute.xlu1 %493 }
 0x85a   :  { %1170 = vmatmul.mubr.msk.f32.vlgmr.msra.gmra.mxu1 %vm72_vm1, %v494_v21 }
 0x85b   :  { %1184 = vmatpush3.msra.mxu1 %v1337_v2  ;;  %1191 = vmatprep.mubr.msk.f32.mxu1 %vm1294_vm0, %v1293_v1 }
 0x85c   :  { %1185 = vmatprep.subr.mxu1 %v1293_v1 }
 0x85d   :  { %1186 = vmatpush3.msra.mxu1 %v1346_v4 }
 0x85e   :  { %1187 = vmatprep.subr.mxu1 %v1293_v1 }
 0x85f   :  { %1188 = vmatpush3.msra.mxu1 %v1355_v6 }
 0x860   :  { %1189 = vmatprep.subr.mxu1 %v1293_v1 }
 0x861   :  { %1190 = vmatpush3.msra.mxu1 %v1363_v7 }
 0x862   :  { %1205 = vmatprep.subr.mxu1 %v1293_v1 }
 0x91a   :  { %v563_v23 = vpop.f32.mrf.mxu1 }
 0x91b   :  { %v564_v24 = vadd.f32 %v563_v23, %v131_v22  ;;  %v144_v22 = vadd.f32 %v1457_v56, %v1398_v12 }
 0x91c   :  { %v1171_v25 = vpop.f32.mrf.mxu1 }
 0x91d   :  { %v1061_v26 = vmul.f32 -1.442695, %v564_v24 }
 0x91f   :  { %1253 = vpow2.f32 %v1061_v26 }
 0x920   :  { %1255 = vtanh.f32 %v564_v24 }
 0x92c   :  { %v1254_v27 = vpop.eup %1253 }
 0x92d   :  { %v570_v28 = vadd.f32 1.0, %v1254_v27  ;;  %v1256_v29 = vpop.eup %1255 }
 0x92f   :  { %1257 = vrcp.f32 %v570_v28 }
 0x93c   :  { %v1258_v30 = vpop.eup %1257 }
 0x93d   :  { %v574_v32 = vsel %vm165_vm2, %v1258_v30, %v1256_v29 }
 0x93e   :  { %577 = vrot.lane.b32.xlu0 %v574_v32, %s1295_s4  ;;  %v575_v33 = vmul.f32 %v574_v32, %v476_v16 }
 0x9b0   :  { %v578_v34 = vpop.permute.xlu0 %577 }
 0x9b1   :  { %v580_v35 = vmul.f32 %v578_v34, %v574_v32 }
 0x9b3   :  { %582 = vrot.lane.b32.xlu1 %v580_v35, %s1295_s4 }
 0xa25   :  { %v583_v36 = vpop.permute.xlu1 %582 }
 0xa26   :  { %v585_v37 = vadd.f32 %v583_v36, %v575_v33 }
 0xa28   :  { %1259 = vtanh.f32 %v585_v37 }
 0xa35   :  { %v1260_v38 = vpop.eup %1259 }
 0xa36   :  { %588 = vrot.lane.b32.xlu0 %v1260_v38, %s1295_s4 }
 0xaa8   :  { %v589_v39 = vpop.permute.xlu0 %588 }
 0xaa9   :  { %v1494_v40 = vmul.f32 %v589_v39, %v574_v32 }
 0xaab   :  { %602 = vrot.lane.b32.xlu1 %v1494_v40, %s1296_s9 }
 0xb1d   :  { %v603_v41 = vpop.permute.xlu1 %602 }
 0xb1e   :  { %1181 = vmatmul.mubr.msk.f32.vlgmr.msra.gmra.mxu0 %vm72_vm1, %v603_v41 }
 0xb1f   :  { %1195 = vmatpush3.msra.mxu0 %v1337_v2  ;;  %1202 = vmatprep.mubr.msk.f32.mxu0 %vm1294_vm0, %v1293_v1 }
 0xb20   :  { %1196 = vmatprep.subr.mxu0 %v1293_v1 }
 0xb21   :  { %1197 = vmatpush3.msra.mxu0 %v1346_v4 }
 0xb22   :  { %1198 = vmatprep.subr.mxu0 %v1293_v1 }
 0xb23   :  { %1199 = vmatpush3.msra.mxu0 %v1355_v6 }
 0xb24   :  { %1200 = vmatprep.subr.mxu0 %v1293_v1 }
 0xb25   :  { %1201 = vmatpush3.msra.mxu0 %v1363_v7 }
 0xbde   :  { %v672_v43 = vpop.f32.mrf.mxu0 }
 0xbdf   :  { %v673_v44 = vadd.f32 %v672_v43, %v136_v42  ;;  %v1297_v42 = vmov 0   ;;  %v147_v43 = vadd.f32 %v1461_v58, %v1398_v12 }
 0xbe0   :  { %v1182_v45 = vpop.f32.mrf.mxu0  ;;  %1221 = vset.pattern.permute.xlu0 %v1297_v42  ;;  %1222 = vset.pattern.permute.xlu1 %v1297_v42 }
 0xbe1   :  { %v1063_v46 = vmul.f32 -1.442695, %v673_v44 }
 0xbe3   :  { %1261 = vpow2.f32 %v1063_v46 }
 0xbe4   :  { %1263 = vtanh.f32 %v673_v44 }
 0xbf0   :  { %v1262_v47 = vpop.eup %1261 }
 0xbf1   :  { %v679_v48 = vadd.f32 1.0, %v1262_v47  ;;  %v1264_v49 = vpop.eup %1263 }
 0xbf3   :  { %1265 = vrcp.f32 %v679_v48 }
 0xc00   :  { %v1266_v50 = vpop.eup %1265 }
 0xc01   :  { %v683_v51 = vsel %vm165_vm2, %v1266_v50, %v1264_v49  ;;  %v162_v50 = vld [vmem:[%s1579_s0] sm:$0xff] }
 0xc02   :  { %686 = vrot.lane.b32.xlu0 %v683_v51, %s1295_s4  ;;  %v684_v55 = vmul.f32 %v683_v51, %v585_v37  ;;  %vm265_vm3 = vcmp.eq.s32.totalorder %v162_v50, 0  ;;  %vm592_vm4 = vcmp.eq.s32.totalorder %v162_v50, 3  ;;  %vm810_vm5 = vcmp.eq.s32.totalorder %v162_v50, 5 }
 0xc03   :  { %v266_v12 = vsel %vm265_vm3, 1, %v1297_v42  ;;  %v593_v58 = vsel %vm592_vm4, 1, %v1297_v42  ;;  %vm1028_vm6 = vcmp.eq.s32.totalorder %v162_v50, 7  ;;  %vm374_vm7 = vcmp.eq.s32.totalorder %v162_v50, 1 }
 0xc04   :  { %v375_v20 = vsel %vm374_vm7, 1, %v1297_v42  ;;  %vm483_vm8 = vcmp.eq.s32.totalorder %v162_v50, 2  ;;  %vm701_vm9 = vcmp.eq.s32.totalorder %v162_v50, 4  ;;  %vm919_vm10 = vcmp.eq.s32.totalorder %v162_v50, 6 }
 0xc74   :  { %v687_v52 = vpop.permute.xlu0 %686 }
 0xc75   :  { %v689_v53 = vmul.f32 %v687_v52, %v683_v51 }
 0xc77   :  { %691 = vrot.lane.b32.xlu1 %v689_v53, %s1295_s4 }
 0xce9   :  { %v692_v57 = vpop.permute.xlu1 %691 }
 0xcea   :  { %v694_v60 = vadd.f32 %v692_v57, %v684_v55  ;;  %v811_v55 = vsel %vm810_vm5, 1, %v1297_v42  ;;  %v1029_v57 = vsel %vm1028_vm6, 1, %v1297_v42 }
 0xcec   :  { %1267 = vtanh.f32 %v694_v60 }
 0xcf9   :  { %v1268_v61 = vpop.eup %1267 }
 0xcfa   :  { %697 = vrot.lane.b32.xlu0 %v1268_v61, %s1295_s4 }
 0xd6c   :  { %v698_v62 = vpop.permute.xlu0 %697 }
 0xd6d   :  { %v1515_v63 = vmul.f32 %v698_v62, %v683_v51  ;;  %v484_v62 = vsel %vm483_vm8, 1, %v1297_v42 }
 0xd6f   :  { %711 = vrot.lane.b32.xlu1 %v1515_v63, %s1296_s9 }
 0xde1   :  { %v712_v0 = vpop.permute.xlu1 %711 }
 0xde2   :  { %1192 = vmatmul.mubr.msk.f32.vlgmr.msra.gmra.mxu1 %vm72_vm1, %v712_v0  ;;  %v702_v0 = vsel %vm701_vm9, 1, %v1297_v42 }
 0xde3   :  { %1206 = vmatpush3.msra.mxu1 %v1337_v2  ;;  %1213 = vmatprep.mubr.msk.f32.mxu1 %vm1294_vm0, %v1293_v1 }
 0xde4   :  { %1207 = vmatprep.subr.mxu1 %v1293_v1 }
 0xde5   :  { %1208 = vmatpush3.msra.mxu1 %v1346_v4 }
 0xde6   :  { %1209 = vmatprep.subr.mxu1 %v1293_v1 }
 0xde7   :  { %1210 = vmatpush3.msra.mxu1 %v1355_v6 }
 0xde8   :  { %1211 = vmatprep.subr.mxu1 %v1293_v1 }
 0xde9   :  { %1212 = vmatpush3.msra.mxu1 %v1363_v7 }
 0xea2   :  { %v781_v5 = vpop.f32.mrf.mxu1 }
 0xea3   :  { %v782_v2 = vadd.f32 %v781_v5, %v139_v3  ;;  %v920_v3 = vsel %vm919_vm10, 1, %v1297_v42 }
 0xea4   :  { %v1193_v8 = vpop.f32.mrf.mxu1 }
 0xea5   :  { %v1065_v9 = vmul.f32 -1.442695, %v782_v2 }
 0xea7   :  { %1269 = vpow2.f32 %v1065_v9 }
 0xea8   :  { %1271 = vtanh.f32 %v782_v2 }
 0xeb4   :  { %v1270_v11 = vpop.eup %1269 }
 0xeb5   :  { %v788_v13 = vadd.f32 1.0, %v1270_v11  ;;  %v1272_v4 = vpop.eup %1271 }
 0xeb7   :  { %1273 = vrcp.f32 %v788_v13 }
 0xec4   :  { %v1274_v14 = vpop.eup %1273 }
 0xec5   :  { %v792_v6 = vsel %vm165_vm2, %v1274_v14, %v1272_v4 }
 0xec6   :  { %795 = vrot.lane.b32.xlu0 %v792_v6, %s1295_s4  ;;  %v793_v59 = vmul.f32 %v792_v6, %v694_v60 }
 0xf38   :  { %v796_v1 = vpop.permute.xlu0 %795 }
 0xf39   :  { %v798_v7 = vmul.f32 %v796_v1, %v792_v6 }
 0xf3b   :  { %800 = vrot.lane.b32.xlu1 %v798_v7, %s1295_s4 }
 0xfad   :  { %v801_v10 = vpop.permute.xlu1 %800 }
 0xfae   :  { %v803_v15 = vadd.f32 %v801_v10, %v793_v59 }
 0xfb0   :  { %1275 = vtanh.f32 %v803_v15 }
 0xfbd   :  { %v1276_v16 = vpop.eup %1275 }
 0xfbe   :  { %806 = vrot.lane.b32.xlu0 %v1276_v16, %s1295_s4 }
0x1030   :  { %v807_v17 = vpop.permute.xlu0 %806 }
0x1031   :  { %v1536_v18 = vmul.f32 %v807_v17, %v792_v6 }
0x1033   :  { %820 = vrot.lane.b32.xlu1 %v1536_v18, %s1296_s9 }
0x10a5   :  { %v821_v21 = vpop.permute.xlu1 %820 }
0x10a6   :  { %1203 = vmatmul.mubr.msk.f32.vlgmr.msra.gmra.mxu0 %vm72_vm1, %v821_v21 }
0x1166   :  { %v890_v23 = vpop.f32.mrf.mxu0 }
0x1167   :  { %v891_v24 = vadd.f32 %v890_v23, %v144_v22 }
0x1168   :  { %v1204_v25 = vpop.f32.mrf.mxu0 }
0x1169   :  { %v1067_v26 = vmul.f32 -1.442695, %v891_v24 }
0x116b   :  { %1277 = vpow2.f32 %v1067_v26 }
0x116c   :  { %1279 = vtanh.f32 %v891_v24 }
0x1178   :  { %v1278_v27 = vpop.eup %1277 }
0x1179   :  { %v897_v28 = vadd.f32 1.0, %v1278_v27  ;;  %v1280_v29 = vpop.eup %1279 }
0x117b   :  { %1281 = vrcp.f32 %v897_v28 }
0x1188   :  { %v1282_v30 = vpop.eup %1281 }
0x1189   :  { %v901_v32 = vsel %vm165_vm2, %v1282_v30, %v1280_v29 }
0x118a   :  { %904 = vrot.lane.b32.xlu0 %v901_v32, %s1295_s4  ;;  %v902_v56 = vmul.f32 %v901_v32, %v803_v15 }
0x11fc   :  { %v905_v34 = vpop.permute.xlu0 %904 }
0x11fd   :  { %v907_v35 = vmul.f32 %v905_v34, %v901_v32 }
0x11ff   :  { %909 = vrot.lane.b32.xlu1 %v907_v35, %s1295_s4 }
0x1271   :  { %v910_v33 = vpop.permute.xlu1 %909 }
0x1272   :  { %v912_v36 = vadd.f32 %v910_v33, %v902_v56 }
0x1274   :  { %1283 = vtanh.f32 %v912_v36 }
0x1281   :  { %v1284_v37 = vpop.eup %1283 }
0x1282   :  { %915 = vrot.lane.b32.xlu0 %v1284_v37, %s1295_s4 }
0x12f4   :  { %v916_v38 = vpop.permute.xlu0 %915 }
0x12f5   :  { %v1548_v39 = vmul.f32 %v916_v38, %v901_v32 }
0x12f7   :  { %929 = vrot.lane.b32.xlu1 %v1548_v39, %s1296_s9 }
0x1369   :  { %v930_v41 = vpop.permute.xlu1 %929 }
0x136a   :  { %1214 = vmatmul.mubr.msk.f32.vlgmr.msra.gmra.mxu1 %vm72_vm1, %v930_v41 }
0x142a   :  { %v999_v44 = vpop.f32.mrf.mxu1 }
0x142b   :  { %v1000_v45 = vadd.f32 %v999_v44, %v147_v43 }
0x142c   :  { %v1215_v46 = vpop.f32.mrf.mxu1 }
0x142d   :  { %v1069_v47 = vmul.f32 -1.442695, %v1000_v45 }
0x142f   :  { %1285 = vpow2.f32 %v1069_v47 }
0x1430   :  { %1287 = vtanh.f32 %v1000_v45 }
0x143c   :  { %v1286_v48 = vpop.eup %1285 }
0x143d   :  { %v1006_v49 = vadd.f32 1.0, %v1286_v48  ;;  %v1288_v51 = vpop.eup %1287 }
0x143f   :  { %1289 = vrcp.f32 %v1006_v49 }
0x144c   :  { %v1290_v52 = vpop.eup %1289 }
0x144d   :  { %v1010_v53 = vsel %vm165_vm2, %v1290_v52, %v1288_v51 }
0x144e   :  { %1013 = vrot.lane.b32.xlu0 %v1010_v53, %s1295_s4  ;;  %v1011_v5 = vmul.f32 %v1010_v53, %v912_v36 }
0x1452   :  { %268 = vperm.xlu0 %1221, %v266_v12  }
0x1456   :  { %595 = vperm.xlu0 %1221, %v593_v58  }
0x145a   :  { %813 = vperm.xlu0 %1221, %v811_v55  }
0x145e   :  { %1031 = vperm.xlu0 %1221, %v1029_v57  }
0x14c0   :  { %v1014_v60 = vpop.permute.xlu0 %1013 }
0x14c1   :  { %v1016_v61 = vmul.f32 %v1014_v60, %v1010_v53 }
0x14c3   :  { %1018 = vrot.lane.b32.xlu1 %v1016_v61, %s1295_s4 }
0x14c7   :  { %377 = vperm.xlu1 %1222, %v375_v20  }
0x14cb   :  { %486 = vperm.xlu1 %1222, %v484_v62  }
0x14cd   :  { %v269_v4 = vpop.permute.xlu0 %268 }
0x14ce   :  { %vm270_vm11 = vcmp.eq.s32.totalorder %v269_v4, 1 }
0x14cf   :  { %704 = vperm.xlu1 %1222, %v702_v0   ;;  %v271_v1 = vsel %vm270_vm11, %v1409_v31, 0.0 }
0x14d1   :  { %v596_v14 = vpop.permute.xlu0 %595 }
0x14d2   :  { %vm597_vm14 = vcmp.eq.s32.totalorder %v596_v14, 1 }
0x14d3   :  { %922 = vperm.xlu1 %1222, %v920_v3  }
0x14d5   :  { %v814_v10 = vpop.permute.xlu0 %813 }
0x14d6   :  { %vm815_vm0 = vcmp.eq.s32.totalorder %v814_v10, 1 }
0x14d9   :  { %v1032_v21 = vpop.permute.xlu0 %1031 }
0x14da   :  { %vm1033_vm3 = vcmp.eq.s32.totalorder %v1032_v21, 1 }
0x1535   :  { %v1019_v2 = vpop.permute.xlu1 %1018 }
0x1536   :  { %v1021_v8 = vadd.f32 %v1019_v2, %v1011_v5 }
0x1538   :  { %1291 = vtanh.f32 %v1021_v8 }
0x1542   :  { %v378_v11 = vpop.permute.xlu1 %377 }
0x1543   :  { %vm379_vm12 = vcmp.eq.s32.totalorder %v378_v11, 1 }
0x1544   :  { %v380_v7 = vsel %vm379_vm12, %v1442_v54, %v271_v1 }
0x1545   :  { %v1292_v9 = vpop.eup %1291 }
0x1546   :  { %1024 = vrot.lane.b32.xlu1 %v1292_v9, %s1295_s4  ;;  %v487_v13 = vpop.permute.xlu1 %486 }
0x1547   :  { %vm488_vm13 = vcmp.eq.s32.totalorder %v487_v13, 1 }
0x1548   :  { %v489_v59 = vsel %vm488_vm13, %v1472_v19, %v380_v7 }
0x1549   :  { %v598_v16 = vsel %vm597_vm14, %v1494_v40, %v489_v59 }
0x154a   :  { %v705_v6 = vpop.permute.xlu1 %704 }
0x154b   :  { %vm706_vm15 = vcmp.eq.s32.totalorder %v705_v6, 1 }
0x154c   :  { %v707_v17 = vsel %vm706_vm15, %v1515_v63, %v598_v16 }
0x154d   :  { %v816_v23 = vsel %vm815_vm0, %v1536_v18, %v707_v17 }
0x154e   :  { %v923_v15 = vpop.permute.xlu1 %922 }
0x154f   :  { %vm924_vm2 = vcmp.eq.s32.totalorder %v923_v15, 1 }
0x1550   :  { %v925_v31 = vsel %vm924_vm2, %v1548_v39, %v816_v23 }
0x15b8   :  { %v1025_v22 = vpop.permute.xlu1 %1024 }
0x15b9   :  { %v1027_v24 = vmul.f32 %v1025_v22, %v1010_v53 }
0x15bb   :  { %v1034_v54 = vsel %vm1033_vm3, %v1027_v24, %v925_v31 }
0x15bc   :  { %1036 = vrot.lane.b32.xlu0 %v1034_v54, %s1296_s9 }
0x162e   :  { %v1037_v19 = vpop.permute.xlu0 %1036 }
0x162f   :  { %1039 = vst.msk [vmem:[%s1580_s5] sm:$0xff] %vm72_vm1, %v1037_v19 }

</bundles_post_ra>
